<compile_context>
chip_gen: v5e
topology: v5e:2x2
jax: 0.10.0
libtpu: 0.0.40
codegen_flags: <defaults>
</compile_context>

<pallas_src>
import jax
import jax.numpy as jnp
from jax.experimental import pallas as pl
from jax.experimental.pallas import tpu as pltpu

BN_EPS = 1e-5
_LANE = 128
_BF16_SUBLANE = 16  # bf16 packs [16, 128] per vreg


def _round_up(x, m):
    return (x + m - 1) // m * m


def _cdiv(a, b):
    return -(-a // b)


# ----------------------------------------------------------------------------
# Kernel body: grid = (batch tiles, hidden tiles).
# ----------------------------------------------------------------------------
def _mlp_kernel(x_ref, w1_ref, b1_ref, w2_ref, b2_ref, o_ref, acc_ref):
    j = pl.program_id(1)

    @pl.when(j == 0)
    def _init():
        acc_ref[...] = jnp.zeros_like(acc_ref)

    # Layer 1 (BatchNorm folded into w1/b1) -> ReLU.  Dropout == identity (eval).
    xb = x_ref[...].astype(jnp.bfloat16)       # in-kernel cast: no extra HBM pass
    h = jnp.dot(xb, w1_ref[...], preferred_element_type=jnp.float32)
    h = jnp.maximum(h + b1_ref[...], 0.0)
    # Layer 2: this hidden tile's partial contribution, f32 accumulation.
    acc_ref[...] += jnp.dot(h.astype(jnp.bfloat16), w2_ref[...],
                            preferred_element_type=jnp.float32)

    @pl.when(j == pl.num_programs(1) - 1)
    def _finalize():
        o_ref[...] = (acc_ref[...] + b2_ref[...]).astype(o_ref.dtype)


# ----------------------------------------------------------------------------
# One-time parameter preparation: fold BN, pad hidden to a lane multiple, bf16.
# ----------------------------------------------------------------------------
def prepare_params(raw_params):
    w1, b1, gamma, beta, mean, var, w2, b2 = raw_params
    scale = gamma * jax.lax.rsqrt(var + BN_EPS)            # (1, hidden)
    w1_f = w1 * scale                                       # per-column scale
    b1_f = (b1 - mean) * scale + beta

    in_size, hidden = w1.shape
    out_size = w2.shape[1]
    # Zero-padded hidden columns (W1/b1) and zero W2 rows are numerically exact
    # and keep W1's last dim / W2's first dim lane- and tile-aligned.
    hidden_pad = _round_up(hidden, _LANE)
    w1_p = jnp.zeros((in_size, hidden_pad), jnp.float32).at[:, :hidden].set(w1_f)
    b1_p = jnp.zeros((1, hidden_pad), jnp.float32).at[:, :hidden].set(b1_f)
    w2_p = jnp.zeros((hidden_pad, out_size), jnp.float32).at[:hidden, :].set(w2)
    return {
        "w1": w1_p.astype(jnp.bfloat16),
        "b1": b1_p.astype(jnp.float32),
        "w2": w2_p.astype(jnp.bfloat16),
        "b2": b2.astype(jnp.float32).reshape(1, out_size),
        "hidden": hidden,
        "out_size": out_size,
    }


# ----------------------------------------------------------------------------
# Generation-aware VMEM budget and tile plan.
# ----------------------------------------------------------------------------
def _vmem_budget_bytes():
    try:
        cap = int(pltpu.get_tpu_info().vmem_capacity_bytes)
    except Exception:
        cap = 64 * 1024 * 1024                 # conservative (v7x-sized) fallback
    return max(cap - 8 * 1024 * 1024, 16 * 1024 * 1024)   # 4-8 MiB headroom


def _plan_tiles(batch, in_size, hidden_pad, out_size, tm_max, budget):
    batch16 = _round_up(max(batch, 1), _BF16_SUBLANE)
    # >= 2 batch steps (when the batch allows) so v7x shards over both TCs; the
    # extra step costs only ~0.35 us on single-TC chips.
    min_steps = 2 if batch16 >= 2 * _BF16_SUBLANE else 1
    nb = max(_cdiv(batch16, tm_max), min_steps)
    tm0 = _round_up(_cdiv(batch16, nb), _BF16_SUBLANE)     # near-equal batch tiles

    m = hidden_pad // _LANE
    th_cands = sorted({_LANE * d for d in range(1, m + 1) if m % d == 0},
                      reverse=True)

    def plan_bytes(tm, th):
        nh = hidden_pad // th
        wbuf = 1 if nh == 1 else 2             # Buffered(1) residents vs streamed
        resident = (in_size * th * 2 + th * 4 + th * out_size * 2) * wbuf
        resident += out_size * 4                                    # b2
        per_step = 2 * tm * in_size * 4 + 2 * tm * out_size * 4     # x/out, dbl-buf
        scratch = tm * out_size * 4 + tm * th * 4                   # acc + h interm.
        return resident + per_step + scratch + 2 * 1024 * 1024      # compiler slack

    # Prefer resident weights (largest th); only then shrink the batch tile.
    for th in th_cands:
        tm = tm0
        while plan_bytes(tm, th) > budget and tm > _LANE:
            tm = max(_LANE, _round_up(tm // 2, _BF16_SUBLANE))
        if plan_bytes(tm, th) <= budget:
            return tm, th
    th = th_cands[-1]
    tm = tm0
    while plan_bytes(tm, th) > budget and tm > _BF16_SUBLANE:
        tm = max(_BF16_SUBLANE, _round_up(tm // 2, _BF16_SUBLANE))
    return tm, th


# ----------------------------------------------------------------------------
# Wrapper.
# ----------------------------------------------------------------------------
def mlp_forward(x, prepared, *, tm_max=1024):
    w1, b1, w2, b2 = prepared["w1"], prepared["b1"], prepared["w2"], prepared["b2"]
    out_size = prepared["out_size"]
    batch, in_size = x.shape
    hidden_pad = w1.shape[1]
    assert w1.shape[0] == in_size

    budget = _vmem_budget_bytes()
    tm, th = _plan_tiles(batch, in_size, hidden_pad, out_size, tm_max, budget)
    nh = hidden_pad // th

    batch_pad = _round_up(batch, tm)
    xp = x if batch_pad == batch else jnp.pad(x, ((0, batch_pad - batch), (0, 0)))
    nb = batch_pad // tm
    grid = (nb, nh)

    flops = 2 * batch_pad * hidden_pad * (in_size + out_size)
    weight_bytes = w1.size * 2 + w2.size * 2 + b1.size * 4 + b2.size * 4
    weight_passes = 1 if nh == 1 else nb       # residents fetched once; else per tile
    bytes_accessed = int(xp.size * xp.dtype.itemsize
                         + weight_passes * weight_bytes
                         + batch_pad * out_size * 4)

    def run(single_buffer_residents):
        res_mode = pl.Buffered(1) if (single_buffer_residents and nh == 1) else None
        b2_mode = pl.Buffered(1) if single_buffer_residents else None
        in_specs = [
            pl.BlockSpec((tm, in_size), lambda i, j: (i, 0)),            # x tile
            pl.BlockSpec((in_size, th), lambda i, j: (0, j),
                         pipeline_mode=res_mode),                        # W1
            pl.BlockSpec((1, th), lambda i, j: (0, j),
                         pipeline_mode=res_mode),                        # b1
            pl.BlockSpec((th, out_size), lambda i, j: (j, 0),
                         pipeline_mode=res_mode),                        # W2
            pl.BlockSpec((1, out_size), lambda i, j: (0, 0),
                         pipeline_mode=b2_mode),                         # b2
        ]
        fn = pl.pallas_call(
            _mlp_kernel,
            out_shape=jax.ShapeDtypeStruct((batch_pad, out_size), jnp.float32),
            grid_spec=pltpu.PrefetchScalarGridSpec(
                num_scalar_prefetch=0,
                grid=grid,
                in_specs=in_specs,
                out_specs=pl.BlockSpec((tm, out_size), lambda i, j: (i, 0)),
                scratch_shapes=[pltpu.VMEM((tm, out_size), jnp.float32)],
            ),
            compiler_params=pltpu.CompilerParams(
                dimension_semantics=("parallel", "arbitrary"),
                vmem_limit_bytes=int(budget),
            ),
            cost_estimate=pl.CostEstimate(
                flops=flops, transcendentals=0, bytes_accessed=bytes_accessed),
        )
        return fn(xp, w1, b1, w2, b2)

    try:
        out = jax.block_until_ready(run(True))
    except Exception:
        # pipeline_mode / Buffered(1) unsupported on this jax build: fall back
        # to default double-buffered operands (correctness over footprint).
        out = jax.block_until_ready(run(False))

    return out if batch_pad == batch else out[:batch]


# ----------------------------------------------------------------------------
# PyTorch-style parameter init (Linear: uniform(-1/sqrt(fan_in), 1/sqrt(fan_in)))
# weights stored as (in, out), i.e. transposed relative to nn.Linear.weight.
# ----------------------------------------------------------------------------
def init_params(key, input_size, hidden_size, output_size):
    k1, k2, k3, k4 = jax.random.split(key, 4)
    lim1 = 1.0 / jnp.sqrt(jnp.float32(input_size))
    lim2 = 1.0 / jnp.sqrt(jnp.float32(hidden_size))
    w1 = jax.random.uniform(k1, (input_size, hidden_size), jnp.float32, -lim1, lim1)
    b1 = jax.random.uniform(k2, (1, hidden_size), jnp.float32, -lim1, lim1)
    w2 = jax.random.uniform(k3, (hidden_size, output_size), jnp.float32, -lim2, lim2)
    b2 = jax.random.uniform(k4, (1, output_size), jnp.float32, -lim2, lim2)
    gamma = jnp.ones((1, hidden_size), jnp.float32)   # BatchNorm1d defaults
    beta = jnp.zeros((1, hidden_size), jnp.float32)
    mean = jnp.zeros((1, hidden_size), jnp.float32)
    var = jnp.ones((1, hidden_size), jnp.float32)
    return (w1, b1, gamma, beta, mean, var, w2, b2)


# ----------------------------------------------------------------------------
# References.
# ----------------------------------------------------------------------------
def mlp_reference_f32(x, raw_params):
    """Pure-f32, unfolded reference (PyTorch eval-mode semantics)."""
    w1, b1, gamma, beta, mean, var, w2, b2 = raw_params
    h = x @ w1 + b1
    h = (h - mean) * jax.lax.rsqrt(var + BN_EPS) * gamma + beta
    h = jnp.maximum(h, 0.0)
    return h @ w2 + b2


def mlp_reference_folded(x, prepared):
    """Reference with the same folded / bf16-quantized operands as the kernel."""
    xb = x.astype(jnp.bfloat16).astype(jnp.float32)
    w1 = prepared["w1"].astype(jnp.float32)
    w2 = prepared["w2"].astype(jnp.float32)
    h = jnp.maximum(xb @ w1 + prepared["b1"], 0.0)
    hb = h.astype(jnp.bfloat16).astype(jnp.float32)
    return hb @ w2 + prepared["b2"]


if __name__ == "__main__":
    batch_size, input_size, hidden_size, output_size = 8, 16, 32, 1

    key = jax.random.PRNGKey(0)
    kx, kp = jax.random.split(key)
    x = jax.random.normal(kx, (batch_size, input_size), jnp.float32)
    raw_params = init_params(kp, input_size, hidden_size, output_size)
    prepared = prepare_params(raw_params)

    out = jax.block_until_ready(mlp_forward(x, prepared))
    assert out.shape == (batch_size, output_size)

    # Tight check vs a reference with identical folded/bf16 operands.
    ref_same = mlp_reference_folded(x, prepared)
    assert jnp.allclose(out, ref_same, atol=2e-3, rtol=2e-3)

    # Loose sanity check vs the pure-f32 PyTorch-style reference (bf16 quant).
    ref_f32 = mlp_reference_f32(x, raw_params)
    assert jnp.allclose(out, ref_f32, atol=5e-2, rtol=5e-2)

    print("KERNEL_OK")
</pallas_src>

<mosaic_0001>
module attributes {stable_mosaic.version = 11 : i64} {
  func.func @_mlp_kernel(%arg0: i32, %arg1: i32, %arg2: memref<16x16xf32, #tpu.memory_space<vmem>>, %arg3: memref<16x128xbf16, #tpu.memory_space<vmem>>, %arg4: memref<1x128xf32, #tpu.memory_space<vmem>>, %arg5: memref<128x1xbf16, #tpu.memory_space<vmem>>, %arg6: memref<1x1xf32, #tpu.memory_space<vmem>>, %arg7: memref<16x1xf32, #tpu.memory_space<vmem>>, %arg8: memref<16x1xf32, #tpu.memory_space<vmem>>) attributes {dimension_semantics = [#tpu.dimension_semantics<parallel>, #tpu.dimension_semantics<arbitrary>], iteration_bounds = array<i64: 1, 1>, scalar_prefetch = 0 : i64, scratch_operands = 1 : i64, tpu.core_type = #tpu.core_type<tc>, window_params = [{transform_indices = @transform_0, window_bounds = array<i64: 16, 16>}, {pipeline_mode = #tpu.pipeline_mode<synchronous>, transform_indices = @transform_1, window_bounds = array<i64: 16, 128>}, {pipeline_mode = #tpu.pipeline_mode<synchronous>, transform_indices = @transform_2, window_bounds = array<i64: 1, 128>}, {pipeline_mode = #tpu.pipeline_mode<synchronous>, transform_indices = @transform_3, window_bounds = array<i64: 128, 1>}, {pipeline_mode = #tpu.pipeline_mode<synchronous>, transform_indices = @transform_4, window_bounds = array<i64: 1, 1>}, {transform_indices = @transform_5, window_bounds = array<i64: 16, 1>}]} {
    %c0_i32 = arith.constant 0 : i32
    %0 = arith.cmpi eq, %arg1, %c0_i32 : i32
    %1 = arith.extui %0 : i1 to i32
    %c0_i32_0 = arith.constant 0 : i32
    %2 = arith.cmpi ne, %1, %c0_i32_0 : i32
    scf.if %2 {
      %cst_16 = arith.constant 0.000000e+00 : f32
      %21 = vector.broadcast %cst_16 : f32 to vector<16x1xf32>
      %c0_17 = arith.constant 0 : index
      %c0_18 = arith.constant 0 : index
      %22 = vector.load %arg8[%c0_17, %c0_18] : memref<16x1xf32, #tpu.memory_space<vmem>>, vector<16x1xf32>
      tpu.vector_store %arg8[%c0_17, %c0_18], %21 {strides = array<i32>} : memref<16x1xf32, #tpu.memory_space<vmem>>, vector<16x1xf32>,
    } else {
    }
    %c0 = arith.constant 0 : index
    %c0_1 = arith.constant 0 : index
    %3 = vector.load %arg2[%c0, %c0_1] : memref<16x16xf32, #tpu.memory_space<vmem>>, vector<16x16xf32>
    %4 = arith.truncf %3 : vector<16x16xf32> to vector<16x16xbf16>
    %c0_2 = arith.constant 0 : index
    %c0_3 = arith.constant 0 : index
    %5 = vector.load %arg3[%c0_2, %c0_3] : memref<16x128xbf16, #tpu.memory_space<vmem>>, vector<16x128xbf16>
    %cst = arith.constant dense<0.000000e+00> : vector<16x128xf32>
    %6 = tpu.matmul %4, %5, %cst {dimension_numbers = #tpu.dot_dimension_numbers<[1], [0], [0], [1], [0, 0, 1, 1], [], []>} : vector<16x16xbf16>, vector<16x128xbf16>, vector<16x128xf32> -> vector<16x128xf32>
    %c0_4 = arith.constant 0 : index
    %c0_5 = arith.constant 0 : index
    %7 = vector.load %arg4[%c0_4, %c0_5] : memref<1x128xf32, #tpu.memory_space<vmem>>, vector<1x128xf32>
    %8 = vector.broadcast %7 : vector<1x128xf32> to vector<16x128xf32>
    %9 = arith.addf %6, %8 : vector<16x128xf32>
    %cst_6 = arith.constant 0.000000e+00 : f32
    %10 = vector.broadcast %cst_6 : f32 to vector<16x128xf32>
    %11 = arith.maximumf %9, %10 : vector<16x128xf32>
    %c0_7 = arith.constant 0 : index
    %c0_8 = arith.constant 0 : index
    %12 = vector.load %arg8[%c0_7, %c0_8] : memref<16x1xf32, #tpu.memory_space<vmem>>, vector<16x1xf32>
    %13 = arith.truncf %11 : vector<16x128xf32> to vector<16x128xbf16>
    %c0_9 = arith.constant 0 : index
    %c0_10 = arith.constant 0 : index
    %14 = vector.load %arg5[%c0_9, %c0_10] : memref<128x1xbf16, #tpu.memory_space<vmem>>, vector<128x1xbf16>
    %cst_11 = arith.constant dense<0.000000e+00> : vector<16x1xf32>
    %15 = tpu.matmul %13, %14, %cst_11 {dimension_numbers = #tpu.dot_dimension_numbers<[1], [0], [0], [1], [0, 0, 1, 1], [], []>} : vector<16x128xbf16>, vector<128x1xbf16>, vector<16x1xf32> -> vector<16x1xf32>
    %16 = arith.addf %12, %15 : vector<16x1xf32>
    %c0_12 = arith.constant 0 : index
    %c0_13 = arith.constant 0 : index
    %17 = vector.load %arg8[%c0_12, %c0_13] : memref<16x1xf32, #tpu.memory_space<vmem>>, vector<16x1xf32>
    tpu.vector_store %arg8[%c0_12, %c0_13], %16 {strides = array<i32>} : memref<16x1xf32, #tpu.memory_space<vmem>>, vector<16x1xf32>,
    %c0_i32_14 = arith.constant 0 : i32
    %18 = arith.cmpi eq, %arg1, %c0_i32_14 : i32
    %19 = arith.extui %18 : i1 to i32
    %c0_i32_15 = arith.constant 0 : i32
    %20 = arith.cmpi ne, %19, %c0_i32_15 : i32
    scf.if %20 {
      %c0_16 = arith.constant 0 : index
      %c0_17 = arith.constant 0 : index
      %21 = vector.load %arg8[%c0_16, %c0_17] : memref<16x1xf32, #tpu.memory_space<vmem>>, vector<16x1xf32>
      %c0_18 = arith.constant 0 : index
      %c0_19 = arith.constant 0 : index
      %22 = vector.load %arg6[%c0_18, %c0_19] : memref<1x1xf32, #tpu.memory_space<vmem>>, vector<1x1xf32>
      %23 = vector.broadcast %22 : vector<1x1xf32> to vector<16x1xf32>
      %24 = arith.addf %21, %23 : vector<16x1xf32>
      %c0_20 = arith.constant 0 : index
      %c0_21 = arith.constant 0 : index
      %25 = vector.load %arg7[%c0_20, %c0_21] : memref<16x1xf32, #tpu.memory_space<vmem>>, vector<16x1xf32>
      tpu.vector_store %arg7[%c0_20, %c0_21], %24 {strides = array<i32>} : memref<16x1xf32, #tpu.memory_space<vmem>>, vector<16x1xf32>,
    } else {
    }
    return
  }
  func.func @transform_0(%arg0: i32, %arg1: i32) -> (i32, i32) {
    %c0_i32 = arith.constant 0 : i32
    %c0_i32_0 = arith.constant 0 : i32
    return %arg0, %c0_i32 : i32, i32
  }
  func.func @transform_1(%arg0: i32, %arg1: i32) -> (i32, i32) {
    %c0_i32 = arith.constant 0 : i32
    %c0_i32_0 = arith.constant 0 : i32
    return %c0_i32, %arg1 : i32, i32
  }
  func.func @transform_2(%arg0: i32, %arg1: i32) -> (i32, i32) {
    %c0_i32 = arith.constant 0 : i32
    %c0_i32_0 = arith.constant 0 : i32
    return %c0_i32, %arg1 : i32, i32
  }
  func.func @transform_3(%arg0: i32, %arg1: i32) -> (i32, i32) {
    %c0_i32 = arith.constant 0 : i32
    %c0_i32_0 = arith.constant 0 : i32
    return %arg1, %c0_i32 : i32, i32
  }
  func.func @transform_4(%arg0: i32, %arg1: i32) -> (i32, i32) {
    %c0_i32 = arith.constant 0 : i32
    %c0_i32_0 = arith.constant 0 : i32
    %c0_i32_1 = arith.constant 0 : i32
    return %c0_i32, %c0_i32_0 : i32, i32
  }
  func.func @transform_5(%arg0: i32, %arg1: i32) -> (i32, i32) {
    %c0_i32 = arith.constant 0 : i32
    %c0_i32_0 = arith.constant 0 : i32
    return %arg0, %c0_i32 : i32, i32
  }
}

module attributes {stable_mosaic.version = 11 : i64} {
  func.func @_mlp_kernel(%arg0: i32, %arg1: i32, %arg2: memref<16x16xf32, #tpu.memory_space<vmem>>, %arg3: memref<16x128xbf16, #tpu.memory_space<vmem>>, %arg4: memref<1x128xf32, #tpu.memory_space<vmem>>, %arg5: memref<128x1xbf16, #tpu.memory_space<vmem>>, %arg6: memref<1x1xf32, #tpu.memory_space<vmem>>, %arg7: memref<16x1xf32, #tpu.memory_space<vmem>>, %arg8: memref<16x1xf32, #tpu.memory_space<vmem>>) attributes {dimension_semantics = [#tpu.dimension_semantics<parallel>, #tpu.dimension_semantics<arbitrary>], iteration_bounds = array<i64: 1, 1>, scalar_prefetch = 0 : i64, scratch_operands = 1 : i64, tpu.core_type = #tpu.core_type<tc>, window_params = [{transform_indices = @transform_0, window_bounds = array<i64: 16, 16>}, {transform_indices = @transform_1, window_bounds = array<i64: 16, 128>}, {transform_indices = @transform_2, window_bounds = array<i64: 1, 128>}, {transform_indices = @transform_3, window_bounds = array<i64: 128, 1>}, {pipeline_mode = #tpu.pipeline_mode<synchronous>, transform_indices = @transform_4, window_bounds = array<i64: 1, 1>}, {transform_indices = @transform_5, window_bounds = array<i64: 16, 1>}]} {
    %c0_i32 = arith.constant 0 : i32
    %0 = arith.cmpi eq, %arg1, %c0_i32 : i32
    %1 = arith.extui %0 : i1 to i32
    %c0_i32_0 = arith.constant 0 : i32
    %2 = arith.cmpi ne, %1, %c0_i32_0 : i32
    scf.if %2 {
      %cst_16 = arith.constant 0.000000e+00 : f32
      %21 = vector.broadcast %cst_16 : f32 to vector<16x1xf32>
      %c0_17 = arith.constant 0 : index
      %c0_18 = arith.constant 0 : index
      %22 = vector.load %arg8[%c0_17, %c0_18] : memref<16x1xf32, #tpu.memory_space<vmem>>, vector<16x1xf32>
      tpu.vector_store %arg8[%c0_17, %c0_18], %21 {strides = array<i32>} : memref<16x1xf32, #tpu.memory_space<vmem>>, vector<16x1xf32>,
    } else {
    }
    %c0 = arith.constant 0 : index
    %c0_1 = arith.constant 0 : index
    %3 = vector.load %arg2[%c0, %c0_1] : memref<16x16xf32, #tpu.memory_space<vmem>>, vector<16x16xf32>
    %4 = arith.truncf %3 : vector<16x16xf32> to vector<16x16xbf16>
    %c0_2 = arith.constant 0 : index
    %c0_3 = arith.constant 0 : index
    %5 = vector.load %arg3[%c0_2, %c0_3] : memref<16x128xbf16, #tpu.memory_space<vmem>>, vector<16x128xbf16>
    %cst = arith.constant dense<0.000000e+00> : vector<16x128xf32>
    %6 = tpu.matmul %4, %5, %cst {dimension_numbers = #tpu.dot_dimension_numbers<[1], [0], [0], [1], [0, 0, 1, 1], [], []>} : vector<16x16xbf16>, vector<16x128xbf16>, vector<16x128xf32> -> vector<16x128xf32>
    %c0_4 = arith.constant 0 : index
    %c0_5 = arith.constant 0 : index
    %7 = vector.load %arg4[%c0_4, %c0_5] : memref<1x128xf32, #tpu.memory_space<vmem>>, vector<1x128xf32>
    %8 = vector.broadcast %7 : vector<1x128xf32> to vector<16x128xf32>
    %9 = arith.addf %6, %8 : vector<16x128xf32>
    %cst_6 = arith.constant 0.000000e+00 : f32
    %10 = vector.broadcast %cst_6 : f32 to vector<16x128xf32>
    %11 = arith.maximumf %9, %10 : vector<16x128xf32>
    %c0_7 = arith.constant 0 : index
    %c0_8 = arith.constant 0 : index
    %12 = vector.load %arg8[%c0_7, %c0_8] : memref<16x1xf32, #tpu.memory_space<vmem>>, vector<16x1xf32>
    %13 = arith.truncf %11 : vector<16x128xf32> to vector<16x128xbf16>
    %c0_9 = arith.constant 0 : index
    %c0_10 = arith.constant 0 : index
    %14 = vector.load %arg5[%c0_9, %c0_10] : memref<128x1xbf16, #tpu.memory_space<vmem>>, vector<128x1xbf16>
    %cst_11 = arith.constant dense<0.000000e+00> : vector<16x1xf32>
    %15 = tpu.matmul %13, %14, %cst_11 {dimension_numbers = #tpu.dot_dimension_numbers<[1], [0], [0], [1], [0, 0, 1, 1], [], []>} : vector<16x128xbf16>, vector<128x1xbf16>, vector<16x1xf32> -> vector<16x1xf32>
    %16 = arith.addf %12, %15 : vector<16x1xf32>
    %c0_12 = arith.constant 0 : index
    %c0_13 = arith.constant 0 : index
    %17 = vector.load %arg8[%c0_12, %c0_13] : memref<16x1xf32, #tpu.memory_space<vmem>>, vector<16x1xf32>
    tpu.vector_store %arg8[%c0_12, %c0_13], %16 {strides = array<i32>} : memref<16x1xf32, #tpu.memory_space<vmem>>, vector<16x1xf32>,
    %c0_i32_14 = arith.constant 0 : i32
    %18 = arith.cmpi eq, %arg1, %c0_i32_14 : i32
    %19 = arith.extui %18 : i1 to i32
    %c0_i32_15 = arith.constant 0 : i32
    %20 = arith.cmpi ne, %19, %c0_i32_15 : i32
    scf.if %20 {
      %c0_16 = arith.constant 0 : index
      %c0_17 = arith.constant 0 : index
      %21 = vector.load %arg8[%c0_16, %c0_17] : memref<16x1xf32, #tpu.memory_space<vmem>>, vector<16x1xf32>
      %c0_18 = arith.constant 0 : index
      %c0_19 = arith.constant 0 : index
      %22 = vector.load %arg6[%c0_18, %c0_19] : memref<1x1xf32, #tpu.memory_space<vmem>>, vector<1x1xf32>
      %23 = vector.broadcast %22 : vector<1x1xf32> to vector<16x1xf32>
      %24 = arith.addf %21, %23 : vector<16x1xf32>
      %c0_20 = arith.constant 0 : index
      %c0_21 = arith.constant 0 : index
      %25 = vector.load %arg7[%c0_20, %c0_21] : memref<16x1xf32, #tpu.memory_space<vmem>>, vector<16x1xf32>
      tpu.vector_store %arg7[%c0_20, %c0_21], %24 {strides = array<i32>} : memref<16x1xf32, #tpu.memory_space<vmem>>, vector<16x1xf32>,
    } else {
    }
    return
  }
  func.func @transform_0(%arg0: i32, %arg1: i32) -> (i32, i32) {
    %c0_i32 = arith.constant 0 : i32
    %c0_i32_0 = arith.constant 0 : i32
    return %arg0, %c0_i32 : i32, i32
  }
  func.func @transform_1(%arg0: i32, %arg1: i32) -> (i32, i32) {
    %c0_i32 = arith.constant 0 : i32
    %c0_i32_0 = arith.constant 0 : i32
    return %c0_i32, %arg1 : i32, i32
  }
  func.func @transform_2(%arg0: i32, %arg1: i32) -> (i32, i32) {
    %c0_i32 = arith.constant 0 : i32
    %c0_i32_0 = arith.constant 0 : i32
    return %c0_i32, %arg1 : i32, i32
  }
  func.func @transform_3(%arg0: i32, %arg1: i32) -> (i32, i32) {
    %c0_i32 = arith.constant 0 : i32
    %c0_i32_0 = arith.constant 0 : i32
    return %arg1, %c0_i32 : i32, i32
  }
  func.func @transform_4(%arg0: i32, %arg1: i32) -> (i32, i32) {
    %c0_i32 = arith.constant 0 : i32
    %c0_i32_0 = arith.constant 0 : i32
    %c0_i32_1 = arith.constant 0 : i32
    return %c0_i32, %c0_i32_0 : i32, i32
  }
  func.func @transform_5(%arg0: i32, %arg1: i32) -> (i32, i32) {
    %c0_i32 = arith.constant 0 : i32
    %c0_i32_0 = arith.constant 0 : i32
    return %arg0, %c0_i32 : i32, i32
  }
}

</mosaic_0001>

<bundles_post_ra>
// kernel: tpu_custom_call.1
= control target key start
LH: loop header
LB: loop body
LE: loop exit
PB: predicated region body
PF: predicated region fallthrough
CT: control target
= control target key end

     0   :  { %vm45_vm0 = vcmask 130048   ;;  %vm27_vm1 = vcmask 7168   ;;  %v217_v13 = vmov 0.0   ;;  %s299_s1 = inlined_call_operand.vmem [shape: bf16[16,128], index: 1, kind: input, shape index: {}]   ;;  %s300_s0 = inlined_call_operand.vmem [shape: f32[16,16], index: 0, kind: input, shape index: {}]   ;;  %s301_s3 = inlined_call_operand.vmem [shape: bf16[128,1], index: 3, kind: input, shape index: {}]   ;;  %s302_s2 = inlined_call_operand.vmem [shape: f32[1,128], index: 2, kind: input, shape index: {}]   ;;  %s303_s4 = inlined_call_operand.<no memory space> [shape: f32[1,1], index: 4, kind: input, shape index: {}]   ;;  %s304_s5 = inlined_call_operand.vmem [shape: f32[16,1], index: 5, kind: output, shape index: {}]  }
   0x1   :  { %v205_v0 = vld [vmem:[%s299_s1] sm:$0xff]  ;;  %v31_v2 = vld [vmem:[%s300_s0 + $0x8] sm:$0xff]  ;;  %v213_v4 = vld [vmem:[%s301_s3 + $0x38] sm:$0xff]  ;;  %v10_v12 = vstv %s303_s4  ;;  %28 = vst.msk [vmem:[#allocation2] sm:$0xff] %vm27_vm1, %v217_v13 }
   0x2   :  { %v30_v1 = vld [vmem:[%s300_s0] sm:$0xff]  ;;  %56 = vmatpush.bf16.msra.mxu0 %v205_v0  ;;  %132 = vmatpush.bf16.msra.mxu1 %v213_v4  ;;  %v212_v5 = vld [vmem:[%s301_s3 + $0x30] sm:$0xff]  ;;  %v211_v6 = vld [vmem:[%s301_s3 + $0x28] sm:$0xff]  ;;  %11 = vst [vmem:[#allocation3] sm:$0x1] %v10_v12 }
   0x3   :  { %v32_v3 = vpack.c.bf16 %v31_v2, %v30_v1  ;;  %v210_v7 = vld [vmem:[%s301_s3 + $0x20] sm:$0xff]  ;;  %v209_v8 = vld [vmem:[%s301_s3 + $0x18] sm:$0xff]  ;;  %v208_v9 = vld [vmem:[%s301_s3 + $0x10] sm:$0xff]  ;;  %29 = vst.msk [vmem:[#allocation2 + $0x8] sm:$0xff] %vm27_vm1, %v217_v13 }
   0x4   :  { %v207_v10 = vld [vmem:[%s301_s3 + $0x8] sm:$0xff]  ;;  %v206_v11 = vld [vmem:[%s301_s3] sm:$0xff] }
   0x5   :  { %172 = vmatmul.msk.bf16.vlgmr.msra.gmra.mxu0 %vm45_vm0, %v32_v3  ;;  %v215_v15 = vld [vmem:[%s302_s2] ss:$0 sm:$0xff] }
   0x6   :  { %133 = vmatpush.bf16.msra.mxu1 %v212_v5 }
   0x8   :  { %v65_v22 = vld [vmem:[#allocation2] sm:$0xff] }
   0x9   :  { %v216_v26 = vld [vmem:[#allocation3] ss:$0 sm:$0xff] }
   0xa   :  { %134 = vmatpush.bf16.msra.mxu1 %v211_v6  ;;  %v66_v25 = vld [vmem:[#allocation2 + $0x8] sm:$0xff] }
   0xe   :  { %135 = vmatpush.bf16.msra.mxu1 %v210_v7 }
  0x12   :  { %136 = vmatpush.bf16.msra.mxu1 %v209_v8 }
  0x16   :  { %137 = vmatpush.bf16.msra.mxu1 %v208_v9 }
  0x1a   :  { %138 = vmatpush.bf16.msra.mxu1 %v207_v10 }
  0x1e   :  { %139 = vmatpush.bf16.msra.mxu1 %v206_v11 }
  0x82   :  { %v58_v14 = vpop.f32.mrf.mxu0 }
  0x83   :  { %v59_v16 = vadd.f32 %v215_v15, %v58_v14 }
  0x85   :  { %v63_v19 = vmax.f32 %v59_v16, 0.0 }
  0x8a   :  { %v60_v17 = vpop.f32.mrf.mxu0 }
  0x8b   :  { %v61_v18 = vadd.f32 %v215_v15, %v60_v17 }
  0x8d   :  { %v64_v20 = vmax.f32 %v61_v18, 0.0 }
  0x8f   :  { %v67_v21 = vpack.c.bf16 %v64_v20, %v63_v19 }
  0x91   :  { %140 = vmatmul.bf16.vlgmr.msra.gmra.mxu1 %v67_v21 }
 0x10e   :  { %v141_v23 = vpop.f32.mrf.mxu1 }
 0x10f   :  { %v146_v24 = vadd.f32 %v141_v23, %v65_v22 }
 0x111   :  { %149 = vst.msk [vmem:[#allocation2] sm:$0xff] %vm27_vm1, %v146_v24 }
 0x116   :  { %v143_v27 = vpop.f32.mrf.mxu1 }
 0x117   :  { %v147_v28 = vadd.f32 %v143_v27, %v66_v25 }
 0x118   :  { %v154_v29 = vld [vmem:[#allocation2] sm:$0xff] }
 0x119   :  { %v160_v30 = vadd.f32 %v216_v26, %v154_v29  ;;  %150 = vst.msk [vmem:[#allocation2 + $0x8] sm:$0xff] %vm27_vm1, %v147_v28 }
 0x11b   :  { %162 = vst.msk [vmem:[%s304_s5] sm:$0xff] %vm27_vm1, %v160_v30 }
 0x120   :  { %v155_v31 = vld [vmem:[#allocation2 + $0x8] sm:$0xff] }
 0x121   :  { %v161_v32 = vadd.f32 %v216_v26, %v155_v31 }
 0x123   :  { %163 = vst.msk [vmem:[%s304_s5 + $0x8] sm:$0xff] %vm27_vm1, %v161_v32 }

// kernel: tpu_custom_call.1
= control target key start
LH: loop header
LB: loop body
LE: loop exit
PB: predicated region body
PF: predicated region fallthrough
CT: control target
= control target key end

     0   :  { %vm45_vm0 = vcmask 130048   ;;  %vm27_vm1 = vcmask 7168   ;;  %v217_v13 = vmov 0.0   ;;  %s299_s1 = inlined_call_operand.vmem [shape: bf16[16,128], index: 1, kind: input, shape index: {}]   ;;  %s300_s0 = inlined_call_operand.vmem [shape: f32[16,16], index: 0, kind: input, shape index: {}]   ;;  %s301_s3 = inlined_call_operand.vmem [shape: bf16[128,1], index: 3, kind: input, shape index: {}]   ;;  %s302_s2 = inlined_call_operand.vmem [shape: f32[1,128], index: 2, kind: input, shape index: {}]   ;;  %s303_s4 = inlined_call_operand.<no memory space> [shape: f32[1,1], index: 4, kind: input, shape index: {}]   ;;  %s304_s5 = inlined_call_operand.vmem [shape: f32[16,1], index: 5, kind: output, shape index: {}]  }
   0x1   :  { %v205_v0 = vld [vmem:[%s299_s1] sm:$0xff]  ;;  %v31_v2 = vld [vmem:[%s300_s0 + $0x8] sm:$0xff]  ;;  %v213_v4 = vld [vmem:[%s301_s3 + $0x38] sm:$0xff]  ;;  %v10_v12 = vstv %s303_s4  ;;  %28 = vst.msk [vmem:[#allocation2] sm:$0xff] %vm27_vm1, %v217_v13 }
   0x2   :  { %v30_v1 = vld [vmem:[%s300_s0] sm:$0xff]  ;;  %56 = vmatpush.bf16.msra.mxu0 %v205_v0  ;;  %132 = vmatpush.bf16.msra.mxu1 %v213_v4  ;;  %v212_v5 = vld [vmem:[%s301_s3 + $0x30] sm:$0xff]  ;;  %v211_v6 = vld [vmem:[%s301_s3 + $0x28] sm:$0xff]  ;;  %11 = vst [vmem:[#allocation3] sm:$0x1] %v10_v12 }
   0x3   :  { %v32_v3 = vpack.c.bf16 %v31_v2, %v30_v1  ;;  %v210_v7 = vld [vmem:[%s301_s3 + $0x20] sm:$0xff]  ;;  %v209_v8 = vld [vmem:[%s301_s3 + $0x18] sm:$0xff]  ;;  %v208_v9 = vld [vmem:[%s301_s3 + $0x10] sm:$0xff]  ;;  %29 = vst.msk [vmem:[#allocation2 + $0x8] sm:$0xff] %vm27_vm1, %v217_v13 }
   0x4   :  { %v207_v10 = vld [vmem:[%s301_s3 + $0x8] sm:$0xff]  ;;  %v206_v11 = vld [vmem:[%s301_s3] sm:$0xff] }
   0x5   :  { %172 = vmatmul.msk.bf16.vlgmr.msra.gmra.mxu0 %vm45_vm0, %v32_v3  ;;  %v215_v15 = vld [vmem:[%s302_s2] ss:$0 sm:$0xff] }
   0x6   :  { %133 = vmatpush.bf16.msra.mxu1 %v212_v5 }
   0x8   :  { %v65_v22 = vld [vmem:[#allocation2] sm:$0xff] }
   0x9   :  { %v216_v26 = vld [vmem:[#allocation3] ss:$0 sm:$0xff] }
   0xa   :  { %134 = vmatpush.bf16.msra.mxu1 %v211_v6  ;;  %v66_v25 = vld [vmem:[#allocation2 + $0x8] sm:$0xff] }
   0xe   :  { %135 = vmatpush.bf16.msra.mxu1 %v210_v7 }
  0x12   :  { %136 = vmatpush.bf16.msra.mxu1 %v209_v8 }
  0x16   :  { %137 = vmatpush.bf16.msra.mxu1 %v208_v9 }
  0x1a   :  { %138 = vmatpush.bf16.msra.mxu1 %v207_v10 }
  0x1e   :  { %139 = vmatpush.bf16.msra.mxu1 %v206_v11 }
  0x82   :  { %v58_v14 = vpop.f32.mrf.mxu0 }
  0x83   :  { %v59_v16 = vadd.f32 %v215_v15, %v58_v14 }
  0x85   :  { %v63_v19 = vmax.f32 %v59_v16, 0.0 }
  0x8a   :  { %v60_v17 = vpop.f32.mrf.mxu0 }
  0x8b   :  { %v61_v18 = vadd.f32 %v215_v15, %v60_v17 }
  0x8d   :  { %v64_v20 = vmax.f32 %v61_v18, 0.0 }
  0x8f   :  { %v67_v21 = vpack.c.bf16 %v64_v20, %v63_v19 }
  0x91   :  { %140 = vmatmul.bf16.vlgmr.msra.gmra.mxu1 %v67_v21 }
 0x10e   :  { %v141_v23 = vpop.f32.mrf.mxu1 }
 0x10f   :  { %v146_v24 = vadd.f32 %v141_v23, %v65_v22 }
 0x111   :  { %149 = vst.msk [vmem:[#allocation2] sm:$0xff] %vm27_vm1, %v146_v24 }
 0x116   :  { %v143_v27 = vpop.f32.mrf.mxu1 }
 0x117   :  { %v147_v28 = vadd.f32 %v143_v27, %v66_v25 }
 0x118   :  { %v154_v29 = vld [vmem:[#allocation2] sm:$0xff] }
 0x119   :  { %v160_v30 = vadd.f32 %v216_v26, %v154_v29  ;;  %150 = vst.msk [vmem:[#allocation2 + $0x8] sm:$0xff] %vm27_vm1, %v147_v28 }
 0x11b   :  { %162 = vst.msk [vmem:[%s304_s5] sm:$0xff] %vm27_vm1, %v160_v30 }
 0x120   :  { %v155_v31 = vld [vmem:[#allocation2 + $0x8] sm:$0xff] }
 0x121   :  { %v161_v32 = vadd.f32 %v216_v26, %v155_v31 }
 0x123   :  { %163 = vst.msk [vmem:[%s304_s5 + $0x8] sm:$0xff] %vm27_vm1, %v161_v32 }

</bundles_post_ra>
